<compile_context>
chip_gen: v5e
topology: v5e:2x2
jax: 0.10.0
libtpu: 0.0.40
codegen_flags: <defaults>
</compile_context>

<pallas_src>
import functools

import jax
import jax.numpy as jnp
from jax.experimental import pallas as pl
from jax.experimental.pallas import tpu as pltpu


def _round_up(n, m):
    return (n + m - 1) // m * m


def _pick_tile(padded_dim, candidates):
    for c in candidates:
        if padded_dim % c == 0:
            return c
    return candidates[-1]


# ---------------------------------------------------------------------------
# Kernel 1: tiled global average pool (HBM-bound part).
# ---------------------------------------------------------------------------
def _pool_kernel(x_ref, o_ref, acc_ref, *, inv_hw):
    # x_ref  : (TR, TS) tile of the (B*C, H*W) view
    # o_ref  : (TR, 1) pooled means (written only on the final reduction step)
    # acc_ref: (TR, 1) f32 running partial sums (VMEM scratch)
    s = pl.program_id(1)

    @pl.when(s == 0)
    def _init():
        acc_ref[...] = jnp.zeros_like(acc_ref)

    # Per-tile cast + lane-axis reduction; only one tile is live at a time.
    acc_ref[...] += jnp.sum(x_ref[...].astype(jnp.float32), axis=-1,
                            keepdims=True)

    @pl.when(s == pl.num_programs(1) - 1)
    def _finalize():
        o_ref[...] = acc_ref[...] * inv_hw


# ---------------------------------------------------------------------------
# Kernel 2: fc1 + ReLU + fc2 + sigmoid (tiny; runs exactly once, no grid).
# ---------------------------------------------------------------------------
def _fc_kernel(y_ref, w1_ref, b1_ref, w2_ref, b2_ref, o_ref):
    y = y_ref[...]                                          # (B, C) f32
    h = jnp.dot(y, w1_ref[...].astype(jnp.float32),
                preferred_element_type=jnp.float32)
    h = jnp.maximum(h + b1_ref[...].astype(jnp.float32), 0.0)
    z = jnp.dot(h, w2_ref[...].astype(jnp.float32),
                preferred_element_type=jnp.float32)
    z = z + b2_ref[...].astype(jnp.float32)
    # sigmoid: exp issues on the EUP; exact reciprocal keeps error <= 1e-6
    # (pass approx=True to push the reciprocal onto the EUP slot as well).
    s = pl.reciprocal(1.0 + jnp.exp(-z))
    o_ref[...] = s.astype(o_ref.dtype)


def filter_layer(x, w1, b1, w2, b2):
    """Pallas implementation of FilterLayer.forward.

    x : (B, C, H, W)  -> returns (B, out_planes, 1, 1)
    """
    B, C, H, W = x.shape
    hidden = w1.shape[1]
    out_planes = w2.shape[1]
    BC, HW = B * C, H * W

    # ---- tile selection ---------------------------------------------------
    # Row tile (sublane axis): multiple of 8, <= 256.
    bc8 = _round_up(BC, 8)
    tr = _pick_tile(bc8, (256, 128, 64, 32, 16, 8))
    bc_pad = _round_up(BC, tr)
    # Spatial tile (lane axis): multiple of 128, <= 2048.  A (256, 2048) f32
    # tile is 2 MiB -> 4 MiB double-buffered + tiny scratch, comfortably inside
    # the default scoped VMEM limits (16 MiB v5e / 32 MiB v6e / 32 MiB v7x).
    hw128 = _round_up(HW, 128)
    if hw128 <= 2048:
        ts = hw128
    else:
        ts = _pick_tile(hw128, (2048, 1024, 512, 256, 128))
    hw_pad = _round_up(HW, ts)

    # Lane-dense 2-D view; zero-pad only when the tiles don't divide evenly
    # (zeros are sum-neutral and we divide by the true H*W; padded rows are
    # sliced off before the FC stage).
    # TODO(synk): replace the pad copy with in-kernel iota masking for odd
    # shapes to avoid one extra HBM pass (not exercised for common shapes).
    x2 = x.reshape(BC, HW)
    if (bc_pad, hw_pad) != (BC, HW):
        x2 = jnp.pad(x2, ((0, bc_pad - BC), (0, hw_pad - HW)))

    grid = (bc_pad // tr, hw_pad // ts)

    pooled = pl.pallas_call(
        functools.partial(_pool_kernel, inv_hw=1.0 / float(HW)),
        out_shape=jax.ShapeDtypeStruct((bc_pad, 1), jnp.float32),
        grid_spec=pltpu.PrefetchScalarGridSpec(
            num_scalar_prefetch=0,
            grid=grid,
            in_specs=[pl.BlockSpec((tr, ts), lambda r, s: (r, s))],
            out_specs=pl.BlockSpec((tr, 1), lambda r, s: (r, 0)),
            scratch_shapes=[pltpu.VMEM((tr, 1), jnp.float32)],
        ),
        compiler_params=pltpu.CompilerParams(
            # Row axis is independent (sharded across TensorCores on megacore
            # parts); spatial axis carries the reduction accumulator.
            dimension_semantics=("parallel", "arbitrary")),
        cost_estimate=pl.CostEstimate(
            flops=int(bc_pad) * int(hw_pad),
            transcendentals=0,
            bytes_accessed=int(bc_pad) * int(hw_pad) * x2.dtype.itemsize
            + int(bc_pad) * 4),
    )(x2)

    # Squeezed descriptor (B, C) in f32 for the (negligible-cost) FC stage.
    y = pooled[:BC, 0].reshape(B, C)

    vmem = pl.BlockSpec(memory_space=pltpu.MemorySpace.VMEM)
    gate = pl.pallas_call(
        _fc_kernel,
        out_shape=jax.ShapeDtypeStruct((B, out_planes), x.dtype),
        in_specs=[vmem, vmem, vmem, vmem, vmem],
        out_specs=vmem,
        cost_estimate=pl.CostEstimate(
            flops=2 * B * C * hidden + 2 * B * hidden * out_planes,
            transcendentals=B * out_planes,
            bytes_accessed=4 * (B * C + C * hidden + hidden
                                + hidden * out_planes + out_planes
                                + B * out_planes)),
    )(y, w1, b1, w2, b2)

    return gate.reshape(B, out_planes, 1, 1)


def init_params(key, in_planes, out_planes, reduction=16, dtype=jnp.float32):
    hidden = out_planes // reduction
    k1, k2, k3, k4 = jax.random.split(key, 4)
    # Deterministic synthetic init (roughly matches nn.Linear's uniform scale).
    w1 = jax.random.uniform(k1, (in_planes, hidden), dtype,
                            -1.0 / in_planes ** 0.5, 1.0 / in_planes ** 0.5)
    b1 = jax.random.uniform(k2, (1, hidden), dtype,
                            -1.0 / in_planes ** 0.5, 1.0 / in_planes ** 0.5)
    w2 = jax.random.uniform(k3, (hidden, out_planes), dtype,
                            -1.0 / hidden ** 0.5, 1.0 / hidden ** 0.5)
    b2 = jax.random.uniform(k4, (1, out_planes), dtype,
                            -1.0 / hidden ** 0.5, 1.0 / hidden ** 0.5)
    return w1, b1, w2, b2


def reference_filter_layer(x, w1, b1, w2, b2):
    """Pure-JAX reference matching the PyTorch module semantics."""
    B, C, _, _ = x.shape
    y = jnp.mean(x, axis=(2, 3))                 # AdaptiveAvgPool2d(1).view(b, c)
    h = jnp.maximum(y @ w1 + b1, 0.0)            # Linear + ReLU
    z = jax.nn.sigmoid(h @ w2 + b2)              # Linear + Sigmoid
    return z.reshape(B, -1, 1, 1)


if __name__ == "__main__":
    # Small shapes consistent with the module: in_planes == input channels.
    B, C, H, W = 2, 4, 16, 16
    in_planes, out_planes, reduction = C, 32, 16   # hidden = 32 // 16 = 2

    key = jax.random.PRNGKey(0)
    kx, kp = jax.random.split(key)
    x = jax.random.normal(kx, (B, C, H, W), jnp.float32)
    w1, b1, w2, b2 = init_params(kp, in_planes, out_planes, reduction)

    out = filter_layer(x, w1, b1, w2, b2)
    out = jax.block_until_ready(out)

    ref = reference_filter_layer(x, w1, b1, w2, b2)
    assert out.shape == (B, out_planes, 1, 1), out.shape
    assert jnp.allclose(out, ref, atol=1e-5, rtol=1e-5), "mismatch vs reference"

    print("KERNEL_OK")
</pallas_src>

<mosaic_0001>
module attributes {stable_mosaic.version = 11 : i64} {
  func.func @_pool_kernel(%arg0: i32, %arg1: i32, %arg2: memref<8x256xf32, #tpu.memory_space<vmem>>, %arg3: memref<8x1xf32, #tpu.memory_space<vmem>>, %arg4: memref<8x1xf32, #tpu.memory_space<vmem>>) attributes {dimension_semantics = [#tpu.dimension_semantics<parallel>, #tpu.dimension_semantics<arbitrary>], iteration_bounds = array<i64: 1, 1>, scalar_prefetch = 0 : i64, scratch_operands = 1 : i64, tpu.core_type = #tpu.core_type<tc>, window_params = [{transform_indices = @transform_0, window_bounds = array<i64: 8, 256>}, {transform_indices = @transform_1, window_bounds = array<i64: 8, 1>}]} {
    %c0_i32 = arith.constant 0 : i32
    %0 = arith.cmpi eq, %arg1, %c0_i32 : i32
    %1 = arith.extui %0 : i1 to i32
    %c0_i32_0 = arith.constant 0 : i32
    %2 = arith.cmpi ne, %1, %c0_i32_0 : i32
    scf.if %2 {
      %cst_8 = arith.constant 0.000000e+00 : f32
      %12 = vector.broadcast %cst_8 : f32 to vector<8x1xf32>
      %c0_9 = arith.constant 0 : index
      %c0_10 = arith.constant 0 : index
      %13 = vector.load %arg4[%c0_9, %c0_10] : memref<8x1xf32, #tpu.memory_space<vmem>>, vector<8x1xf32>
      tpu.vector_store %arg4[%c0_9, %c0_10], %12 {strides = array<i32>} : memref<8x1xf32, #tpu.memory_space<vmem>>, vector<8x1xf32>,
    } else {
    }
    %c0 = arith.constant 0 : index
    %c0_1 = arith.constant 0 : index
    %3 = vector.load %arg4[%c0, %c0_1] : memref<8x1xf32, #tpu.memory_space<vmem>>, vector<8x1xf32>
    %c0_2 = arith.constant 0 : index
    %c0_3 = arith.constant 0 : index
    %4 = vector.load %arg2[%c0_2, %c0_3] : memref<8x256xf32, #tpu.memory_space<vmem>>, vector<8x256xf32>
    %cst = arith.constant dense<0.000000e+00> : vector<8xf32>
    %5 = vector.multi_reduction <add>, %4, %cst [1] : vector<8x256xf32> to vector<8xf32>
    %6 = vector.shape_cast %5 : vector<8xf32> to vector<8x1xf32>
    %7 = arith.addf %3, %6 : vector<8x1xf32>
    %c0_4 = arith.constant 0 : index
    %c0_5 = arith.constant 0 : index
    %8 = vector.load %arg4[%c0_4, %c0_5] : memref<8x1xf32, #tpu.memory_space<vmem>>, vector<8x1xf32>
    tpu.vector_store %arg4[%c0_4, %c0_5], %7 {strides = array<i32>} : memref<8x1xf32, #tpu.memory_space<vmem>>, vector<8x1xf32>,
    %c0_i32_6 = arith.constant 0 : i32
    %9 = arith.cmpi eq, %arg1, %c0_i32_6 : i32
    %10 = arith.extui %9 : i1 to i32
    %c0_i32_7 = arith.constant 0 : i32
    %11 = arith.cmpi ne, %10, %c0_i32_7 : i32
    scf.if %11 {
      %c0_8 = arith.constant 0 : index
      %c0_9 = arith.constant 0 : index
      %12 = vector.load %arg4[%c0_8, %c0_9] : memref<8x1xf32, #tpu.memory_space<vmem>>, vector<8x1xf32>
      %cst_10 = arith.constant 3.906250e-03 : f32
      %13 = vector.broadcast %cst_10 : f32 to vector<8x1xf32>
      %14 = arith.mulf %12, %13 : vector<8x1xf32>
      %c0_11 = arith.constant 0 : index
      %c0_12 = arith.constant 0 : index
      %15 = vector.load %arg3[%c0_11, %c0_12] : memref<8x1xf32, #tpu.memory_space<vmem>>, vector<8x1xf32>
      tpu.vector_store %arg3[%c0_11, %c0_12], %14 {strides = array<i32>} : memref<8x1xf32, #tpu.memory_space<vmem>>, vector<8x1xf32>,
    } else {
    }
    return
  }
  func.func @transform_0(%arg0: i32, %arg1: i32) -> (i32, i32) {
    %c0_i32 = arith.constant 0 : i32
    return %arg0, %arg1 : i32, i32
  }
  func.func @transform_1(%arg0: i32, %arg1: i32) -> (i32, i32) {
    %c0_i32 = arith.constant 0 : i32
    %c0_i32_0 = arith.constant 0 : i32
    return %arg0, %c0_i32 : i32, i32
  }
}

</mosaic_0001>

<bundles_post_ra>
// kernel: tpu_custom_call.1
= control target key start
LH: loop header
LB: loop body
LE: loop exit
PB: predicated region body
PF: predicated region fallthrough
CT: control target
= control target key end

     0   :  { %6 = vsyncpa [#allocation4], 0  ;;  %s76_s9 = smov [#allocation3]   ;;  %s94_s0 = inlined_call_operand.hbm [shape: f32[8,256], index: 0, kind: input, shape index: {}]   ;;  %s95_s1 = inlined_call_operand.vmem [shape: f32[8,1], index: 1, kind: output, shape index: {}]  }
   0x1   :  { %s12_s8 = sshll.u32 %s94_s0, 4  ;;  %s14_s10 = sshll.u32 %s76_s9, 4  ;;  %s13_s8 = int_to_ptr.hbm [resolvable:$true] %s12_s8  ;;  %s15_s10 = int_to_ptr.vmem [resolvable:$true] %s14_s10 }
   0x2   :  { %17 = dma.hbm_to_vmem [thread:$0]  %s13_s8, 256, %s15_s10, [#allocation4]  }
   0x3   :  { %74 = dma.done.wait [#allocation4], 256  }
   0x4   :  { %75 = vsyncadd [#allocation4], 4294967040  ;;  %vm26_vm0 = vcmask 7168   ;;  %v77_v0 = vmov 0.0   ;;  %v29_v1 = vld [vmem:[#allocation3] sm:$0xff]  ;;  %v30_v2 = vld [vmem:[#allocation3 + $0x8] sm:$0xff] }
   0x5   :  { %27 = vst.msk [vmem:[#allocation2] sm:$0xff] %vm26_vm0, %v77_v0  ;;  %v31_v3 = vadd.f32 %v30_v2, %v29_v1 }
   0x7   :  { %32 = vadd.xlane.f32.xlu0 %v31_v3 }
   0xc   :  { %v28_v4 = vld [vmem:[#allocation2] sm:$0xff] }
  0x7a   :  { %v33_v5 = vpop.xlane.xlu0 %32 }
  0x7b   :  { %v34_v6 = vadd.f32 %v33_v5, %v28_v4 }
  0x7d   :  { %36 = vst.msk [vmem:[#allocation2] sm:$0xff] %vm26_vm0, %v34_v6 }
  0x84   :  { %v40_v7 = vld [vmem:[#allocation2] sm:$0xff] }
  0x85   :  { %v41_v8 = vmul.f32 0.00390625, %v40_v7 }
  0x87   :  { %42 = vst.msk [vmem:[%s95_s1] sm:$0xff] %vm26_vm0, %v41_v8 }
  0x88   :  { %47 = vsyncpa [#allocation4], 1 }

</bundles_post_ra>
